<compile_context>
chip_gen: v6e
topology: v6e:2x2x1
jax: 0.10.0
libtpu: 0.0.40
codegen_flags: <defaults>
</compile_context>

<pallas_src>
import numpy as np
import jax
import jax.numpy as jnp
from jax.experimental import pallas as pl
from jax.experimental.pallas import tpu as pltpu

EPS = 1e-5            # nn.BatchNorm2d default eps
NEG_SLOPE = 0.2       # nn.LeakyReLU(0.2)
VMEM_LIMIT = 48 * 1024 * 1024   # explicit scoped-VMEM budget (fits v5e/v6e/v7x)


def _round_up(x, m):
    return ((x + m - 1) // m) * m


def _pick_m_tile(m, kc_p, c_blk, budget_bytes=24 << 20):
    """Largest lane tile (multiple of 128) whose double-buffered blocks fit."""
    # dominant per-lane VMEM of pass 1: 2x bf16 pat buffers + 2x f32 y buffers
    per_lane = 2 * kc_p * 2 + 2 * c_blk * 4
    mt = max(128, (budget_bytes // per_lane) // 128 * 128)
    m128 = _round_up(m, 128)
    if m128 <= mt:
        return m128, m128            # single tile covers all of (padded) M
    mt = min(mt, 8192)               # keep the stream pipeline-friendly
    return mt, _round_up(m, mt)


# ---------------------------------------------------------------------------
# Pass 1: conv matmul (bf16 -> f32) + per-channel sum / sum-of-squares.
# ---------------------------------------------------------------------------
def _conv_stats_kernel(p_ref, w_ref, y_ref, s1_ref, s2_ref):
    # p_ref : (Kc_p, Mt)   bf16 im2col patches (zero-padded rows/lanes)
    # w_ref : (c_blk, Kc_p) bf16 conv weights for this channel block
    # y_ref : (c_blk, Mt)  f32 conv output tile (written every step)
    # s1/s2 : (c_blk, 1)   f32 accumulators, resident across the M axis
    y = jnp.dot(w_ref[...], p_ref[...], preferred_element_type=jnp.float32)
    y_ref[...] = y

    @pl.when(pl.program_id(1) == 0)
    def _():
        s1_ref[...] = jnp.zeros_like(s1_ref)
        s2_ref[...] = jnp.zeros_like(s2_ref)

    # Padded lanes of `pat` are zero -> zero columns of y -> no mask needed.
    s1_ref[...] += jnp.sum(y, axis=1, keepdims=True)
    s2_ref[...] += jnp.sum(y * y, axis=1, keepdims=True)


# ---------------------------------------------------------------------------
# Pass 2: BatchNorm normalize (precomputed mean / inv-std) + LeakyReLU(0.2).
# ---------------------------------------------------------------------------
def _bn_act_kernel(y_ref, mean_ref, invstd_ref, o_ref):
    yn = (y_ref[...] - mean_ref[...]) * invstd_ref[...]
    o_ref[...] = jnp.where(yn >= 0.0, yn, NEG_SLOPE * yn)


def conv_block(x_nchw, w_oihw, *, stride=1, padding=1):
    """convBlock.forward: Conv2d(bias=False) -> BatchNorm2d -> LeakyReLU(0.2).

    x_nchw: (N, Cin, H, W); w_oihw: (Cout, Cin, KH, KW) (PyTorch layout).
    """
    N, Cin, H, W = x_nchw.shape
    Cout, Cin2, KH, KW = w_oihw.shape
    assert Cin2 == Cin
    S, P = stride, padding
    Ho = (H + 2 * P - KH) // S + 1
    Wo = (W + 2 * P - KW) // S + 1

    # bf16 feeds to the MXU; all accumulation / BN / activation math stays f32.
    x = x_nchw.astype(jnp.bfloat16)
    w = w_oihw.astype(jnp.bfloat16)

    # ---- host-side layout plumbing: zero-pad + im2col (no FLOPs) ----
    xp = jnp.pad(x, ((0, 0), (0, 0), (P, P), (P, P)))         # (N, Cin, Hp, Wp)
    taps = []
    for dh in range(KH):
        for dw in range(KW):
            taps.append(xp[:, :, dh:dh + S * Ho:S, dw:dw + S * Wo:S])
    pat = jnp.stack(taps, axis=2)                              # (N,Cin,K*K,Ho,Wo)
    pat = jnp.transpose(pat, (1, 2, 0, 3, 4)).reshape(Cin * KH * KW,
                                                      N * Ho * Wo)

    Kc = Cin * KH * KW
    M = N * Ho * Wo
    Kc_p = _round_up(Kc, 16)              # bf16 sublane packing
    Cout_p = _round_up(Cout, 8)
    if Cout_p > 128:                      # fixed fallback: pad to /128 blocks
        Cout_p = _round_up(Cout, 128)
        c_blk = 128
    else:
        c_blk = Cout_p
    Mt, Mp = _pick_m_tile(M, Kc_p, c_blk)

    pat = jnp.pad(pat, ((0, Kc_p - Kc), (0, Mp - M)))
    wf = jnp.pad(w.reshape(Cout, Kc), ((0, Cout_p - Cout), (0, Kc_p - Kc)))

    n_cblk = Cout_p // c_blk
    n_mt = Mp // Mt

    # ---- pass 1: conv + per-channel statistics -----------------------------
    y, s1, s2 = pl.pallas_call(
        _conv_stats_kernel,
        out_shape=(jax.ShapeDtypeStruct((Cout_p, Mp), jnp.float32),
                   jax.ShapeDtypeStruct((Cout_p, 1), jnp.float32),
                   jax.ShapeDtypeStruct((Cout_p, 1), jnp.float32)),
        grid_spec=pltpu.PrefetchScalarGridSpec(
            num_scalar_prefetch=0,
            grid=(n_cblk, n_mt),
            in_specs=[
                pl.BlockSpec((Kc_p, Mt), lambda i, j: (0, j)),     # patches
                pl.BlockSpec((c_blk, Kc_p), lambda i, j: (i, 0)),  # weights
            ],
            out_specs=[
                pl.BlockSpec((c_blk, Mt), lambda i, j: (i, j)),    # y
                pl.BlockSpec((c_blk, 1), lambda i, j: (i, 0)),     # s1 (resident)
                pl.BlockSpec((c_blk, 1), lambda i, j: (i, 0)),     # s2 (resident)
            ]),
        compiler_params=pltpu.CompilerParams(
            dimension_semantics=("parallel", "arbitrary"),
            vmem_limit_bytes=VMEM_LIMIT),
    )(pat, wf)

    # ---- tiny per-channel BN finalize (host-side XLA on (Cout_p, 1)) -------
    inv_count = 1.0 / float(M)
    mean = s1 * inv_count
    var = jnp.maximum(s2 * inv_count - mean * mean, 0.0)  # guard cancellation
    invstd = jax.lax.rsqrt(var + EPS)

    # ---- pass 2: normalize + LeakyReLU, streamed over M tiles --------------
    out = pl.pallas_call(
        _bn_act_kernel,
        out_shape=jax.ShapeDtypeStruct((Cout_p, Mp), jnp.float32),
        grid_spec=pltpu.PrefetchScalarGridSpec(
            num_scalar_prefetch=0,
            grid=(n_cblk, n_mt),
            in_specs=[
                pl.BlockSpec((c_blk, Mt), lambda i, j: (i, j)),
                pl.BlockSpec((c_blk, 1), lambda i, j: (i, 0)),
                pl.BlockSpec((c_blk, 1), lambda i, j: (i, 0)),
            ],
            out_specs=pl.BlockSpec((c_blk, Mt), lambda i, j: (i, j))),
        compiler_params=pltpu.CompilerParams(
            dimension_semantics=("parallel", "parallel"),
            vmem_limit_bytes=VMEM_LIMIT),
    )(y, mean, invstd)

    # TODO(synk): write per-image M tiles straight into an (N, Cout, Ho*Wo)
    # layout from pass 2 to drop this host-side transpose (extra HBM pass).
    out = out[:Cout, :M].reshape(Cout, N, Ho, Wo)
    return jnp.transpose(out, (1, 0, 2, 3))                    # back to NCHW


def ref_forward(x, w, *, stride=1, padding=1):
    """Pure-JAX reference of convBlock.forward (BN with batch statistics)."""
    y = jax.lax.conv_general_dilated(
        x, w, (stride, stride), ((padding, padding), (padding, padding)),
        dimension_numbers=("NCHW", "OIHW", "NCHW"))
    mean = jnp.mean(y, axis=(0, 2, 3), keepdims=True)
    var = jnp.mean((y - mean) ** 2, axis=(0, 2, 3), keepdims=True)
    yn = (y - mean) * jax.lax.rsqrt(var + EPS)
    return jnp.where(yn >= 0.0, yn, NEG_SLOPE * yn)


if __name__ == "__main__":
    # convBlock(inplanes=4, outplanes=8, kernel=3, stride=1, padding=1)
    N, Cin, Cout, H, W = 2, 4, 8, 16, 16
    kern, stride, pad = 3, 1, 1

    key = jax.random.PRNGKey(0)
    kx, kw = jax.random.split(key)
    x = jax.random.normal(kx, (N, Cin, H, W), jnp.float32)
    w = jax.random.normal(kw, (Cout, Cin, kern, kern), jnp.float32) / np.sqrt(
        kern * kern * Cin)

    out = conv_block(x, w, stride=stride, padding=pad)
    out = jax.block_until_ready(out)

    ref = ref_forward(x, w, stride=stride, padding=pad)
    err = float(jnp.max(jnp.abs(out - ref)))
    assert out.shape == (N, Cout, H, W), out.shape
    # bf16 MXU inputs (per perf review) -> slightly looser tolerance than f32.
    assert err < 5e-2, f"max abs err {err}"
    print("KERNEL_OK")
</pallas_src>

<mosaic_0001>
module attributes {stable_mosaic.version = 11 : i64} {
  func.func @_conv_stats_kernel(%arg0: i32, %arg1: i32, %arg2: memref<48x512xbf16, #tpu.memory_space<vmem>>, %arg3: memref<8x48xbf16, #tpu.memory_space<vmem>>, %arg4: memref<8x512xf32, #tpu.memory_space<vmem>>, %arg5: memref<8x1xf32, #tpu.memory_space<vmem>>, %arg6: memref<8x1xf32, #tpu.memory_space<vmem>>) attributes {dimension_semantics = [#tpu.dimension_semantics<parallel>, #tpu.dimension_semantics<arbitrary>], iteration_bounds = array<i64: 1, 1>, scalar_prefetch = 0 : i64, scratch_operands = 0 : i64, tpu.core_type = #tpu.core_type<tc>, window_params = [{transform_indices = @transform_0, window_bounds = array<i64: 48, 512>}, {transform_indices = @transform_1, window_bounds = array<i64: 8, 48>}, {transform_indices = @transform_2, window_bounds = array<i64: 8, 512>}, {transform_indices = @transform_3, window_bounds = array<i64: 8, 1>}, {transform_indices = @transform_4, window_bounds = array<i64: 8, 1>}]} {
    %c0 = arith.constant 0 : index
    %c0_0 = arith.constant 0 : index
    %0 = vector.load %arg3[%c0, %c0_0] : memref<8x48xbf16, #tpu.memory_space<vmem>>, vector<8x48xbf16>
    %c0_1 = arith.constant 0 : index
    %c0_2 = arith.constant 0 : index
    %1 = vector.load %arg2[%c0_1, %c0_2] : memref<48x512xbf16, #tpu.memory_space<vmem>>, vector<48x512xbf16>
    %cst = arith.constant dense<0.000000e+00> : vector<8x512xf32>
    %2 = tpu.matmul %0, %1, %cst {dimension_numbers = #tpu.dot_dimension_numbers<[1], [0], [0], [1], [0, 0, 1, 1], [], []>} : vector<8x48xbf16>, vector<48x512xbf16>, vector<8x512xf32> -> vector<8x512xf32>
    %c0_3 = arith.constant 0 : index
    %c0_4 = arith.constant 0 : index
    %3 = vector.load %arg4[%c0_3, %c0_4] : memref<8x512xf32, #tpu.memory_space<vmem>>, vector<8x512xf32>
    tpu.vector_store %arg4[%c0_3, %c0_4], %2 {strides = array<i32>} : memref<8x512xf32, #tpu.memory_space<vmem>>, vector<8x512xf32>,
    %c0_i32 = arith.constant 0 : i32
    %4 = arith.cmpi eq, %arg1, %c0_i32 : i32
    %5 = arith.extui %4 : i1 to i32
    %c0_i32_5 = arith.constant 0 : i32
    %6 = arith.cmpi ne, %5, %c0_i32_5 : i32
    scf.if %6 {
      %cst_16 = arith.constant 0.000000e+00 : f32
      %18 = vector.broadcast %cst_16 : f32 to vector<8x1xf32>
      %c0_17 = arith.constant 0 : index
      %c0_18 = arith.constant 0 : index
      %19 = vector.load %arg5[%c0_17, %c0_18] : memref<8x1xf32, #tpu.memory_space<vmem>>, vector<8x1xf32>
      tpu.vector_store %arg5[%c0_17, %c0_18], %18 {strides = array<i32>} : memref<8x1xf32, #tpu.memory_space<vmem>>, vector<8x1xf32>,
      %cst_19 = arith.constant 0.000000e+00 : f32
      %20 = vector.broadcast %cst_19 : f32 to vector<8x1xf32>
      %c0_20 = arith.constant 0 : index
      %c0_21 = arith.constant 0 : index
      %21 = vector.load %arg6[%c0_20, %c0_21] : memref<8x1xf32, #tpu.memory_space<vmem>>, vector<8x1xf32>
      tpu.vector_store %arg6[%c0_20, %c0_21], %20 {strides = array<i32>} : memref<8x1xf32, #tpu.memory_space<vmem>>, vector<8x1xf32>,
    } else {
    }
    %c0_6 = arith.constant 0 : index
    %c0_7 = arith.constant 0 : index
    %7 = vector.load %arg5[%c0_6, %c0_7] : memref<8x1xf32, #tpu.memory_space<vmem>>, vector<8x1xf32>
    %cst_8 = arith.constant dense<0.000000e+00> : vector<8xf32>
    %8 = vector.multi_reduction <add>, %2, %cst_8 [1] : vector<8x512xf32> to vector<8xf32>
    %9 = vector.shape_cast %8 : vector<8xf32> to vector<8x1xf32>
    %10 = arith.addf %7, %9 : vector<8x1xf32>
    %c0_9 = arith.constant 0 : index
    %c0_10 = arith.constant 0 : index
    %11 = vector.load %arg5[%c0_9, %c0_10] : memref<8x1xf32, #tpu.memory_space<vmem>>, vector<8x1xf32>
    tpu.vector_store %arg5[%c0_9, %c0_10], %10 {strides = array<i32>} : memref<8x1xf32, #tpu.memory_space<vmem>>, vector<8x1xf32>,
    %c0_11 = arith.constant 0 : index
    %c0_12 = arith.constant 0 : index
    %12 = vector.load %arg6[%c0_11, %c0_12] : memref<8x1xf32, #tpu.memory_space<vmem>>, vector<8x1xf32>
    %13 = arith.mulf %2, %2 : vector<8x512xf32>
    %cst_13 = arith.constant dense<0.000000e+00> : vector<8xf32>
    %14 = vector.multi_reduction <add>, %13, %cst_13 [1] : vector<8x512xf32> to vector<8xf32>
    %15 = vector.shape_cast %14 : vector<8xf32> to vector<8x1xf32>
    %16 = arith.addf %12, %15 : vector<8x1xf32>
    %c0_14 = arith.constant 0 : index
    %c0_15 = arith.constant 0 : index
    %17 = vector.load %arg6[%c0_14, %c0_15] : memref<8x1xf32, #tpu.memory_space<vmem>>, vector<8x1xf32>
    tpu.vector_store %arg6[%c0_14, %c0_15], %16 {strides = array<i32>} : memref<8x1xf32, #tpu.memory_space<vmem>>, vector<8x1xf32>,
    return
  }
  func.func @transform_0(%arg0: i32, %arg1: i32) -> (i32, i32) {
    %c0_i32 = arith.constant 0 : i32
    %c0_i32_0 = arith.constant 0 : i32
    return %c0_i32, %arg1 : i32, i32
  }
  func.func @transform_1(%arg0: i32, %arg1: i32) -> (i32, i32) {
    %c0_i32 = arith.constant 0 : i32
    %c0_i32_0 = arith.constant 0 : i32
    return %arg0, %c0_i32 : i32, i32
  }
  func.func @transform_2(%arg0: i32, %arg1: i32) -> (i32, i32) {
    %c0_i32 = arith.constant 0 : i32
    return %arg0, %arg1 : i32, i32
  }
  func.func @transform_3(%arg0: i32, %arg1: i32) -> (i32, i32) {
    %c0_i32 = arith.constant 0 : i32
    %c0_i32_0 = arith.constant 0 : i32
    return %arg0, %c0_i32 : i32, i32
  }
  func.func @transform_4(%arg0: i32, %arg1: i32) -> (i32, i32) {
    %c0_i32 = arith.constant 0 : i32
    %c0_i32_0 = arith.constant 0 : i32
    return %arg0, %c0_i32 : i32, i32
  }
}

</mosaic_0001>

<bundles_post_ra>
// kernel: tpu_custom_call.1
= control target key start
LH: loop header
LB: loop body
LE: loop exit
PB: predicated region body
PF: predicated region fallthrough
CT: control target
= control target key end

     0   :  { %10 = vsyncpa [#allocation3], 0  ;;  %s425_s0 = inlined_call_operand.hbm [shape: bf16[48,512], index: 0, kind: input, shape index: {}]   ;;  %s426_s1 = inlined_call_operand.hbm [shape: bf16[8,48], index: 1, kind: input, shape index: {}]   ;;  %s427_s2 = inlined_call_operand.hbm [shape: f32[8,512], index: 2, kind: output, shape index: {0}]   ;;  %s428_s3 = inlined_call_operand.vmem [shape: f32[8,1], index: 3, kind: output, shape index: {1}]   ;;  %s429_s4 = inlined_call_operand.vmem [shape: f32[8,1], index: 4, kind: output, shape index: {2}]  }
   0x1   :  { %11 = vsyncpa [#allocation6], 0 }
   0x2   :  { %12 = vsyncpa [#allocation4], 0  ;;  %s362_s15 = smov [#allocation2]  }
   0x3   :  { %s18_s16 = sshll.u32 %s362_s15, 4  ;;  %s19_s16 = int_to_ptr.vmem [resolvable:$true] %s18_s16 }
   0x4   :  { %s304_s17 = scalar_lea.vmem %s19_s16, 1536  ;;  %p309_p1 = scmp.lt.s32.totalorder %s19_s16, %s19_s16 }
   0x5   :  { %p305_p0 = scmp.ne.s32.totalorder %s19_s16, %s304_s17  ;;  %p310_p2 = scmp.lt.s32.totalorder %s304_s17, %s304_s17 }
   0x7   :  { %p311_p3 = por %p310_p2, %p309_p1 }
   0x9   :  { %p312_p4 = pnand %p311_p3, %p305_p0 }
   0xb   :  { %315 = shalt.err (!%p312_p4)
}
   0xc   :  { %s363_s18 = smov 256   ;;  %s364_s19 = smov 16  }
   0xd   :  { %24 = dma.hbm_to_vmem [thread:$0]  %s425_s0, 1536, %s19_s16, [#allocation3], %s363_s18, %s363_s18, %s364_s19  }
   0xe   :  { %s365_s22 = smov [#allocation5]  }
   0xf   :  { %s31_s23 = sshll.u32 %s365_s22, 4  ;;  %s32_s23 = int_to_ptr.vmem [resolvable:$true] %s31_s23 }
  0x10   :  { %s324_s24 = scalar_lea.vmem %s32_s23, 64  ;;  %p329_p6 = scmp.lt.s32.totalorder %s32_s23, %s32_s23 }
  0x11   :  { %p325_p5 = scmp.ne.s32.totalorder %s32_s23, %s324_s24  ;;  %p330_p7 = scmp.lt.s32.totalorder %s324_s24, %s324_s24 }
  0x13   :  { %p331_p8 = por %p330_p7, %p329_p6 }
  0x15   :  { %p332_p9 = pnand %p331_p8, %p325_p5 }
  0x17   :  { %335 = shalt.err (!%p332_p9)
}
  0x18   :  { %34 = dma.hbm_to_vmem [thread:$0]  %s426_s1, 64, %s32_s23, [#allocation6]  }
  0x19   :  { %356 = dma.done.wait [#allocation3], 1536  }
  0x1a   :  { %357 = vsyncadd [#allocation3], 4294965760 }
  0x1b   :  { %358 = dma.done.wait [#allocation6], 64  }
  0x1c   :  { %359 = vsyncadd [#allocation6], 4294967232  ;;  %v366_v0 = vmov 0   ;;  %v278_v1 = vld [vmem:[#allocation2 + $0x44] ss:$16 sps:$4 sm:$0xff]   ;;  %vm115_vm0 = vcmask 392192  }
  0x1d   :  { %151 = vmatprep.mubr.bf16.mxu0 %v366_v0  ;;  %192 = vmatprep.mubr.bf16.mxu1 %v366_v0  ;;  %v280_v2 = vld [vmem:[#allocation2 + $0x4c] ss:$16 sps:$4 sm:$0xff]   ;;  %v282_v3 = vld [vmem:[#allocation2 + $0x40] ss:$16 sps:$4 sm:$0xff]   ;;  %v283_v4 = vld [vmem:[#allocation2 + $0x48] ss:$16 sps:$4 sm:$0xff]  }
  0x1e   :  { %129 = vmatprep.subr.bf16.mxu0 %v278_v1  ;;  %170 = vmatprep.subr.bf16.mxu1 %v280_v2  ;;  %v284_v5 = vld [vmem:[#allocation2 + $0x24] ss:$16 sps:$4 sm:$0xff]   ;;  %v286_v6 = vld [vmem:[#allocation2 + $0x2c] ss:$16 sps:$4 sm:$0xff]   ;;  %v288_v7 = vld [vmem:[#allocation2 + $0x20] ss:$16 sps:$4 sm:$0xff]  }
  0x1f   :  { %130 = vmatpush1.bf16.msra.mxu0 %v282_v3  ;;  %171 = vmatpush1.bf16.msra.mxu1 %v283_v4  ;;  %v289_v8 = vld [vmem:[#allocation2 + $0x28] ss:$16 sps:$4 sm:$0xff]   ;;  %v290_v9 = vld [vmem:[#allocation2 + $0x4] ss:$16 sps:$4 sm:$0xff]   ;;  %v292_v10 = vld [vmem:[#allocation2 + $0xc] ss:$16 sps:$4 sm:$0xff]  }
  0x20   :  { %131 = vmatprep.subr.bf16.mxu0 %v284_v5  ;;  %172 = vmatprep.subr.bf16.mxu1 %v286_v6  ;;  %v294_v11 = vld [vmem:[#allocation2] ss:$16 sps:$4 sm:$0xff]   ;;  %v295_v12 = vld [vmem:[#allocation2 + $0x8] ss:$16 sps:$4 sm:$0xff]   ;;  %vm209_vm1 = vcmask 7168   ;;  %v367_v14 = vmov 0.0  }
  0x21   :  { %v42_v13 = vld [vmem:[#allocation5] sm:$0xf]  ;;  %210 = vst.msk [vmem:[%s428_s3] sm:$0xff] %vm209_vm1, %v367_v14  ;;  %211 = vst.msk [vmem:[%s429_s4] sm:$0xff] %vm209_vm1, %v367_v14  ;;  %s368_s29 = smov [#allocation7]  }
  0x22   :  { %s239_s30 = sshll.u32 %s368_s29, 4  ;;  %s240_s30 = int_to_ptr.vmem [resolvable:$true] %s239_s30 }
  0x23   :  { %132 = vmatpush1.bf16.msra.mxu0 %v288_v7  ;;  %173 = vmatpush1.bf16.msra.mxu1 %v289_v8  ;;  %s336_s5 = scalar_lea.vmem %s240_s30, 512  ;;  %p341_p11 = scmp.lt.s32.totalorder %s240_s30, %s240_s30 }
  0x24   :  { %133 = vmatprep.subr.bf16.mxu0 %v290_v9  ;;  %174 = vmatprep.subr.bf16.mxu1 %v292_v10  ;;  %p337_p10 = scmp.ne.s32.totalorder %s240_s30, %s336_s5  ;;  %p342_p12 = scmp.lt.s32.totalorder %s336_s5, %s336_s5 }
  0x26   :  { %p343_p13 = por %p342_p12, %p341_p11 }
  0x27   :  { %134 = vmatpush1.bf16.msra.mxu0 %v294_v11  ;;  %175 = vmatpush1.bf16.msra.mxu1 %v295_v12 }
  0x28   :  { %p344_p0 = pnand %p343_p13, %p337_p10 }
  0x2a   :  { %269 = vmatmul.mubr.msk.bf16.vlgmr.msra.gmra.mxu0 %vm115_vm0, %v42_v13  ;;  %270 = vmatmul.mubr.msk.bf16.vlgmr.msra.gmra.mxu1 %vm115_vm0, %v42_v13 }
  0xea   :  { %v153_v15 = vpop.f32.mrf.mxu0  ;;  %v194_v16 = vpop.f32.mrf.mxu1 }
  0xeb   :  { %201 = vst [vmem:[#allocation7] sm:$0xff] %v153_v15  ;;  %203 = vst [vmem:[#allocation7 + $0x10] sm:$0xff] %v194_v16  ;;  %v222_v19 = vmul.f32 %v153_v15, %v153_v15  ;;  %v224_v20 = vmul.f32 %v194_v16, %v194_v16 }
  0xec   :  { %v155_v17 = vpop.f32.mrf.mxu0  ;;  %v196_v18 = vpop.f32.mrf.mxu1 }
  0xed   :  { %202 = vst [vmem:[#allocation7 + $0x8] sm:$0xff] %v155_v17  ;;  %v213_v21 = vadd.f32 %v155_v17, %v153_v15  ;;  %v223_v22 = vmul.f32 %v155_v17, %v155_v17  ;;  %204 = vst [vmem:[#allocation7 + $0x18] sm:$0xff] %v196_v18  ;;  %v225_v31 = vmul.f32 %v196_v18, %v196_v18 }
  0xee   :  { %v157_v23 = vpop.f32.mrf.mxu0  ;;  %v198_v24 = vpop.f32.mrf.mxu1 }
  0xef   :  { %v214_v25 = vadd.f32 %v213_v21, %v194_v16  ;;  %v226_v26 = vadd.f32 %v223_v22, %v222_v19 }
  0xf0   :  { %v158_v27 = vpop.f32.mrf.mxu0  ;;  %v199_v28 = vpop.f32.mrf.mxu1 }
  0xf1   :  { %v215_v29 = vadd.f32 %v214_v25, %v196_v18  ;;  %v227_v30 = vadd.f32 %v226_v26, %v224_v20 }
  0xf3   :  { %216 = vadd.xlane.f32.xlu0 %v215_v29  ;;  %v228_v32 = vadd.f32 %v227_v30, %v225_v31 }
  0xf7   :  { %229 = vadd.xlane.f32.xlu0 %v228_v32 }
  0xf8   :  { %347 = shalt.err (!%p344_p0)
}
  0xf9   :  { %242 = dma.vmem_to_hbm [thread:$0]  %s240_s30, 512, %s427_s2, [#allocation4]   ;;  %v212_v33 = vld [vmem:[%s428_s3] sm:$0xff] }
  0xfa   :  { %v221_v36 = vld [vmem:[%s429_s4] sm:$0xff] }
 0x17c   :  { %v217_v34 = vpop.xlane.xlu0 %216 }
 0x17d   :  { %v218_v35 = vadd.f32 %v217_v34, %v212_v33 }
 0x17f   :  { %220 = vst.msk [vmem:[%s428_s3] sm:$0xff] %vm209_vm1, %v218_v35 }
 0x180   :  { %v230_v37 = vpop.xlane.xlu0 %229 }
 0x181   :  { %v231_v38 = vadd.f32 %v230_v37, %v221_v36 }
 0x183   :  { %232 = vst.msk [vmem:[%s429_s4] sm:$0xff] %vm209_vm1, %v231_v38 }
 0x184   :  { %360 = dma.done.wait [#allocation4], 512  }
 0x185   :  { %361 = vsyncadd [#allocation4], 4294966784 }
 0x186   :  { %254 = vsyncpa [#allocation3], 1 }
 0x187   :  { %255 = vsyncpa [#allocation6], 1 }
 0x188   :  { %256 = vsyncpa [#allocation4], 1 }

</bundles_post_ra>
